<compile_context>
chip_gen: v5e
topology: v5e:2x2
jax: 0.10.0
libtpu: 0.0.40
codegen_flags: <defaults>
</compile_context>

<pallas_src>
import functools

import jax
import jax.numpy as jnp
from jax import lax
from jax.experimental import pallas as pl
from jax.experimental.pallas import tpu as pltpu


# ------------------------------ hyper-params -------------------------------- #

LR = 0.008
WEIGHT_DECAY = 0.003
MOMENTUM = 0.9

# MXU operand dtype: bf16 operands + f32 accumulation hit the native MXU rate
# (918 TF/s on v6e/v7x, 197 TF/s on v5e).  Use jnp.float32 for strict f32 parity.
MXU_DTYPE = jnp.bfloat16


def _pick_tiles():
    """Generation-aware tiles + scoped-VMEM limit for the tiled matmul path."""
    try:
        vmem_bytes = pltpu.get_tpu_info().vmem_capacity_bytes
    except Exception:
        vmem_bytes = 64 * 1024 * 1024  # conservative (v7x-sized) default
    if vmem_bytes >= 128 * 1024 * 1024:
        # v5e / v6e: 128 MiB VMEM -> large tiles, 256-aligned N/K for the MXU.
        # Double-buffered f32 working set ~= 11 MiB; raise the scoped limit anyway.
        return 512, 512, 1024, 96 * 1024 * 1024
    # v7x: 64 MiB physical VMEM -> smaller tiles, leave headroom under physical.
    return 256, 256, 512, 48 * 1024 * 1024


TM, TN, TK, VMEM_LIMIT = _pick_tiles()


# ------------------------------ Pallas kernels ------------------------------ #

def _linear_small_kernel(x_ref, w_ref, o_ref):
    # z = x @ W.T on the MXU, bf16 operands, f32 accumulation, no in-kernel
    # transpose: contract x dim 1 against w dim 1.
    o_ref[...] = lax.dot_general(
        x_ref[...].astype(MXU_DTYPE), w_ref[...].astype(MXU_DTYPE),
        dimension_numbers=(((1,), (1,)), ((), ())),
        preferred_element_type=jnp.float32,
    ).astype(o_ref.dtype)


def _linear_tiled_kernel(x_ref, w_ref, o_ref, acc_ref):
    # Gridded z = x @ W.T with a resident f32 accumulator over the K axis.
    @pl.when(pl.program_id(2) == 0)
    def _():
        acc_ref[...] = jnp.zeros_like(acc_ref)

    acc_ref[...] += lax.dot_general(
        x_ref[...].astype(MXU_DTYPE), w_ref[...].astype(MXU_DTYPE),
        dimension_numbers=(((1,), (1,)), ((), ())),
        preferred_element_type=jnp.float32,
    )

    @pl.when(pl.program_id(2) == pl.num_programs(2) - 1)
    def _():
        o_ref[...] = acc_ref[...].astype(o_ref.dtype)


def _fused_train_kernel(x_ref, lab_ref, w_ref, buf_ref,
                        z_ref, new_w_ref, new_buf_ref, dw_acc,
                        *, total_batch):
    """Batch-gridded: logits, softmax, CE grad, dW accumulation, fused SGD update.

    Per grid step i:  x tile (TB, D), labels tile (TB, 1); W / momentum resident.
    dW is accumulated in a VMEM f32 scratch; the SGD(momentum, weight_decay)
    update is applied on the last step and written to the aliased outputs.
    """
    i = pl.program_id(0)

    @pl.when(i == 0)
    def _():
        dw_acc[...] = jnp.zeros_like(dw_acc)

    x = x_ref[...]                       # (TB, D) f32
    w = w_ref[...]                       # (O, D)  f32
    x_mx = x.astype(MXU_DTYPE)

    # z = x @ W.T  (MXU, f32 accumulation, no transpose)
    z = lax.dot_general(
        x_mx, w.astype(MXU_DTYPE),
        dimension_numbers=(((1,), (1,)), ((), ())),
        preferred_element_type=jnp.float32,
    )                                    # (TB, O)
    z_ref[...] = z.astype(z_ref.dtype)

    # Exact softmax(z): max/sum -> XLU, exp -> EUP, exact divide (torch parity).
    m = jnp.max(z, axis=-1, keepdims=True)
    e = jnp.exp(z - m)
    probs = e / jnp.sum(e, axis=-1, keepdims=True)

    # one_hot(labels) without gather: broadcasted iota == labels (VPU).
    tb, out = z.shape
    onehot = (lax.broadcasted_iota(jnp.int32, (tb, out), 1)
              == lab_ref[...]).astype(jnp.float32)

    # CrossEntropyLoss (mean reduction over the FULL batch) gradient wrt logits.
    dz = (probs - onehot) * (1.0 / total_batch)

    # dW += dZ.T @ x  (MXU, contract over the batch axis of both operands).
    dw_acc[...] += lax.dot_general(
        dz.astype(MXU_DTYPE), x_mx,
        dimension_numbers=(((0,), (0,)), ((), ())),
        preferred_element_type=jnp.float32,
    )

    # Fused torch.optim.SGD: weight decay added to grad, then momentum update.
    @pl.when(i == pl.num_programs(0) - 1)
    def _():
        grad = dw_acc[...] + WEIGHT_DECAY * w
        buf = MOMENTUM * buf_ref[...] + grad
        new_w_ref[...] = (w - LR * buf).astype(new_w_ref.dtype)
        new_buf_ref[...] = buf.astype(new_buf_ref.dtype)


# ------------------------------ kernel wrappers ------------------------------ #

@jax.jit
def linear_forward(x, w):
    """z = x @ w.T  (PyTorch nn.Linear with bias=False)."""
    B, D = x.shape
    O, D2 = w.shape
    assert D == D2

    cost = pl.CostEstimate(
        flops=2 * B * D * O,
        transcendentals=0,
        bytes_accessed=4 * (B * D + O * D + B * O),
    )

    if (B % TM == 0) and (O % TN == 0) and (D % TK == 0):
        grid = (B // TM, O // TN, D // TK)
        return pl.pallas_call(
            _linear_tiled_kernel,
            out_shape=jax.ShapeDtypeStruct((B, O), jnp.float32),
            grid_spec=pltpu.PrefetchScalarGridSpec(
                num_scalar_prefetch=0,
                grid=grid,
                in_specs=[
                    pl.BlockSpec((TM, TK), lambda i, j, k: (i, k)),
                    pl.BlockSpec((TN, TK), lambda i, j, k: (j, k)),
                ],
                out_specs=pl.BlockSpec((TM, TN), lambda i, j, k: (i, j)),
                scratch_shapes=[pltpu.VMEM((TM, TN), jnp.float32)],
            ),
            compiler_params=pltpu.CompilerParams(
                dimension_semantics=("parallel", "parallel", "arbitrary"),
                vmem_limit_bytes=VMEM_LIMIT),
            cost_estimate=cost,
        )(x, w)

    # Small / unaligned shapes: single full-array block.
    return pl.pallas_call(
        _linear_small_kernel,
        out_shape=jax.ShapeDtypeStruct((B, O), jnp.float32),
        in_specs=[
            pl.BlockSpec((B, D), lambda: (0, 0)),
            pl.BlockSpec((O, D), lambda: (0, 0)),
        ],
        out_specs=pl.BlockSpec((B, O), lambda: (0, 0)),
        cost_estimate=cost,
    )(x, w)


def _pick_batch_tile(B):
    for tb in (512, 256, 128, 64, 32, 16, 8):
        if B % tb == 0:
            return tb
    return B


@functools.partial(jax.jit, donate_argnums=(2, 3))
def _train_step(x, labels2d, weight, momentum_buf):
    """Fused forward + CE grad + in-place SGD(momentum, weight_decay) update.

    One pallas_call: batch-gridded, dW accumulated in VMEM, new weight/momentum
    written to outputs aliased onto the (donated) input buffers.  Matches
    torch.optim.SGD semantics; a zero-initialized momentum buffer reproduces
    torch's first-step `buf = grad` special case exactly.
    """
    B, D = x.shape
    O, _ = weight.shape
    TB = _pick_batch_tile(B)

    cost = pl.CostEstimate(
        flops=4 * B * D * O + 6 * O * D,     # two matmuls + SGD epilogue
        transcendentals=2 * B * O,            # exp + divide
        bytes_accessed=4 * (B * D + 4 * O * D + B * O) + 4 * B,
    )

    kernel = functools.partial(_fused_train_kernel, total_batch=B)

    z, new_w, new_buf = pl.pallas_call(
        kernel,
        out_shape=(
            jax.ShapeDtypeStruct((B, O), jnp.float32),   # logits (pre-update W)
            jax.ShapeDtypeStruct((O, D), jnp.float32),   # new weight
            jax.ShapeDtypeStruct((O, D), jnp.float32),   # new momentum buffer
        ),
        grid_spec=pltpu.PrefetchScalarGridSpec(
            num_scalar_prefetch=0,
            grid=(B // TB,),
            in_specs=[
                pl.BlockSpec((TB, D), lambda i: (i, 0)),   # x tile (pipelined)
                pl.BlockSpec((TB, 1), lambda i: (i, 0)),   # labels tile
                pl.BlockSpec((O, D), lambda i: (0, 0)),    # weight (resident)
                pl.BlockSpec((O, D), lambda i: (0, 0)),    # momentum (resident)
            ],
            out_specs=(
                pl.BlockSpec((TB, O), lambda i: (i, 0)),   # logits tile
                pl.BlockSpec((O, D), lambda i: (0, 0)),    # new weight
                pl.BlockSpec((O, D), lambda i: (0, 0)),    # new momentum
            ),
            scratch_shapes=[pltpu.VMEM((O, D), jnp.float32)],  # dW accumulator
        ),
        compiler_params=pltpu.CompilerParams(
            dimension_semantics=("arbitrary",),            # dW reduces over batch
            vmem_limit_bytes=VMEM_LIMIT),
        cost_estimate=cost,
        input_output_aliases={2: 1, 3: 2},                 # weight/momentum in place
    )(x, labels2d, weight, momentum_buf)
    return z, new_w, new_buf


# ---------------------------- module-level wrapper --------------------------- #

class ClassificationLayer:
    """JAX/Pallas port of the PyTorch ClassificationLayer."""

    def __init__(self, input_size, output_size, key):
        self.input_size = input_size
        self.output_size = output_size
        self.threshold = output_size
        # PyTorch nn.Linear default init: U(-1/sqrt(in), 1/sqrt(in)), shape (out, in)
        bound = 1.0 / (input_size ** 0.5)
        self.weight = jax.random.uniform(
            key, (output_size, input_size), dtype=jnp.float32,
            minval=-bound, maxval=bound,
        )
        self.momentum_buf = jnp.zeros_like(self.weight)

    def forward(self, x, classification_labels, freeze=False):
        if freeze:
            # Logits only; no weight update (optimizer.zero_grad + no backward).
            return linear_forward(x, self.weight)
        labels2d = classification_labels.astype(jnp.int32).reshape(-1, 1)
        z, new_w, new_buf = _train_step(x, labels2d, self.weight, self.momentum_buf)
        self.weight = new_w
        self.momentum_buf = new_buf
        return z  # logits computed with pre-update weights (detached)

    def eval(self, x):
        return linear_forward(x, self.weight)


# ----------------------------------- main ------------------------------------ #

if __name__ == "__main__":
    key = jax.random.PRNGKey(0)
    k_w, k_x, k_y, k_x2, k_w2 = jax.random.split(key, 5)

    batch, input_size, output_size = 8, 32, 16
    layer = ClassificationLayer(input_size, output_size, k_w)

    x = jax.random.normal(k_x, (batch, input_size), dtype=jnp.float32)
    labels = jax.random.randint(k_y, (batch,), 0, output_size)

    # The kernels feed the MXU with bf16 operands (f32 accumulation); mirror
    # that operand rounding in the pure-JAX reference so tolerances stay tight.
    def mxu_round(a):
        return a.astype(MXU_DTYPE).astype(jnp.float32)

    # ---- references, computed BEFORE the (buffer-donating) train step ----
    w0 = layer.weight
    x_r, w_r = mxu_round(x), mxu_round(w0)
    z_ref = jnp.matmul(x_r, w_r.T, precision="highest")
    probs_ref = jax.nn.softmax(z_ref, axis=-1)
    onehot_ref = jax.nn.one_hot(labels, output_size, dtype=jnp.float32)
    dz_ref = (probs_ref - onehot_ref) / batch
    dw_ref = jnp.matmul(mxu_round(dz_ref).T, x_r, precision="highest")
    grad_ref = dw_ref + WEIGHT_DECAY * w0
    w1_ref = w0 - LR * grad_ref                      # momentum buffer starts at zero
    z_ref, w1_ref = jax.block_until_ready((z_ref, w1_ref))

    # ---- eval path (Pallas matmul, small single-block path) ----
    z_eval = layer.eval(x)
    jax.block_until_ready(z_eval)
    assert jnp.allclose(z_eval, z_ref, atol=1e-4, rtol=1e-4)

    # ---- fused train step: logits use pre-update weights, weights get SGD step ----
    z_train = layer.forward(x, labels, freeze=False)
    jax.block_until_ready((z_train, layer.weight, layer.momentum_buf))
    assert jnp.allclose(z_train, z_ref, atol=1e-4, rtol=1e-4)
    assert jnp.allclose(layer.weight, w1_ref, atol=1e-4, rtol=1e-4)

    # ---- frozen forward uses the updated weights, no further update ----
    z_frozen = layer.forward(x, labels, freeze=True)
    jax.block_until_ready(z_frozen)
    z_frozen_ref = jnp.matmul(mxu_round(x), mxu_round(layer.weight).T,
                              precision="highest")
    assert jnp.allclose(z_frozen, z_frozen_ref, atol=1e-4, rtol=1e-4)

    # ---- larger, tile-aligned shapes exercise the gridded/tiled matmul path ----
    Bb, Db, Ob = TM, 2 * TK, TN
    xb = jax.random.normal(k_x2, (Bb, Db), dtype=jnp.float32)
    wb = jax.random.uniform(k_w2, (Ob, Db), dtype=jnp.float32,
                            minval=-0.05, maxval=0.05)
    zb = linear_forward(xb, wb)
    jax.block_until_ready(zb)
    zb_ref = jnp.matmul(mxu_round(xb), mxu_round(wb).T, precision="highest")
    assert jnp.allclose(zb, zb_ref, atol=5e-3, rtol=5e-3)

    print("KERNEL_OK")
</pallas_src>

<mosaic_0001>
module attributes {stable_mosaic.version = 11 : i64} {
  func.func @_linear_small_kernel(%arg0: memref<8x32xf32, #tpu.memory_space<vmem>>, %arg1: memref<16x32xf32, #tpu.memory_space<vmem>>, %arg2: memref<8x16xf32, #tpu.memory_space<vmem>>) attributes {dimension_semantics = [], scalar_prefetch = 0 : i64, scratch_operands = 0 : i64, tpu.core_type = #tpu.core_type<tc>} {
    %c0 = arith.constant 0 : index
    %c0_0 = arith.constant 0 : index
    %0 = vector.load %arg0[%c0, %c0_0] : memref<8x32xf32, #tpu.memory_space<vmem>>, vector<8x32xf32>
    %1 = arith.truncf %0 : vector<8x32xf32> to vector<8x32xbf16>
    %c0_1 = arith.constant 0 : index
    %c0_2 = arith.constant 0 : index
    %2 = vector.load %arg1[%c0_1, %c0_2] : memref<16x32xf32, #tpu.memory_space<vmem>>, vector<16x32xf32>
    %3 = arith.truncf %2 : vector<16x32xf32> to vector<16x32xbf16>
    %cst = arith.constant dense<0.000000e+00> : vector<8x16xf32>
    %4 = tpu.matmul %1, %3, %cst {dimension_numbers = #tpu.dot_dimension_numbers<[1], [1], [0], [0], [0, 0, 1, 0], [], []>} : vector<8x32xbf16>, vector<16x32xbf16>, vector<8x16xf32> -> vector<8x16xf32>
    %c0_3 = arith.constant 0 : index
    %c0_4 = arith.constant 0 : index
    %5 = vector.load %arg2[%c0_3, %c0_4] : memref<8x16xf32, #tpu.memory_space<vmem>>, vector<8x16xf32>
    tpu.vector_store %arg2[%c0_3, %c0_4], %4 {strides = array<i32>} : memref<8x16xf32, #tpu.memory_space<vmem>>, vector<8x16xf32>,
    return
  }
}

</mosaic_0001>

<bundles_post_ra>
// kernel: linear_forward.1
= control target key start
LH: loop header
LB: loop body
LE: loop exit
PB: predicated region body
PF: predicated region fallthrough
CT: control target
= control target key end

     0   :  { %7 = vsyncpa [#allocation3], 0  ;;  %s201_s0 = inlined_call_operand.hbm [shape: f32[8,32], index: 0, kind: input, shape index: {}]   ;;  %s202_s1 = inlined_call_operand.hbm [shape: f32[16,32], index: 1, kind: input, shape index: {}]   ;;  %s203_s2 = inlined_call_operand.hbm [shape: f32[8,16], index: 2, kind: output, shape index: {}]  }
   0x1   :  { %8 = vsyncpa [#allocation6], 0 }
   0x2   :  { %9 = vsyncpa [#allocation4], 0  ;;  %s15_s11 = sshll.u32 %s201_s0, 4  ;;  %s172_s12 = smov [#allocation2]   ;;  %s16_s11 = int_to_ptr.hbm [resolvable:$true] %s15_s11 }
   0x3   :  { %s17_s13 = sshll.u32 %s172_s12, 4  ;;  %s25_s16 = sshll.u32 %s202_s1, 4  ;;  %s18_s13 = int_to_ptr.vmem [resolvable:$true] %s17_s13  ;;  %s26_s16 = int_to_ptr.hbm [resolvable:$true] %s25_s16 }
   0x4   :  { %20 = dma.hbm_to_vmem [thread:$0]  %s16_s11, 128, %s18_s13, [#allocation3]  }
   0x5   :  { %s173_s17 = smov [#allocation5]   ;;  %s174_s19 = smov 128  }
   0x6   :  { %s27_s18 = sshll.u32 %s173_s17, 4  ;;  %s175_s20 = smov 8   ;;  %s28_s18 = int_to_ptr.vmem [resolvable:$true] %s27_s18 }
   0x7   :  { %33 = dma.hbm_to_vmem [thread:$0]  %s26_s16, 256, %s28_s18, [#allocation6], %s174_s19, %s174_s19, %s175_s20  }
   0x8   :  { %166 = dma.done.wait [#allocation3], 128  }
   0x9   :  { %167 = vsyncadd [#allocation3], 4294967168 }
   0xa   :  { %168 = dma.done.wait [#allocation6], 256  }
   0xb   :  { %169 = vsyncadd [#allocation6], 4294967040  ;;  %v45_v0 = vld [vmem:[#allocation5] sm:$0xff]  ;;  %v46_v1 = vld [vmem:[#allocation5 + $0x8] sm:$0xff]  ;;  %vm48_vm0 = vcmask 261120   ;;  %s176_s0 = smov [#allocation7]  }
   0xc   :  { %v47_v2 = vpack.c.bf16 %v46_v1, %v45_v0  ;;  %v43_v4 = vld [vmem:[#allocation2] sm:$0xff]  ;;  %s75_s1 = sshll.u32 %s176_s0, 4  ;;  %s77_s23 = sshll.u32 %s203_s2, 4  ;;  %vm68_vm1 = vcmask 130048   ;;  %s76_s1 = int_to_ptr.vmem [resolvable:$true] %s75_s1  ;;  %s78_s23 = int_to_ptr.hbm [resolvable:$true] %s77_s23 }
   0xd   :  { %v44_v5 = vpack.c.bf16 %v43_v4, %v43_v4 }
   0xe   :  { %v53_v3 = vsel %vm48_vm0, %v47_v2, 0 }
   0xf   :  { %62 = vmatpush.bf16.xpose.msra.mxu0 %v53_v3 }
  0x16   :  { %88 = vmatmul.msk.bf16.vlgmr.msra.gmra.mxu0 %vm48_vm0, %v44_v5 }
  0x93   :  { %v64_v6 = vpop.f32.mrf.mxu0 }
  0x94   :  { %69 = vst.msk [vmem:[#allocation7] sm:$0xff] %vm68_vm1, %v64_v6 }
  0x95   :  { %80 = dma.vmem_to_hbm [thread:$0]  %s76_s1, 128, %s78_s23, [#allocation4]  }
  0x9b   :  { %v66_v7 = vpop.f32.mrf.mxu0 }
  0x9c   :  { %170 = dma.done.wait [#allocation4], 128  }
  0x9d   :  { %171 = vsyncadd [#allocation4], 4294967168 }
  0x9e   :  { %85 = vsyncpa [#allocation3], 1 }
  0x9f   :  { %86 = vsyncpa [#allocation6], 1 }
  0xa0   :  { %87 = vsyncpa [#allocation4], 1 }

</bundles_post_ra>
